<compile_context>
chip_gen: v6e
topology: v6e:2x2x1
jax: 0.10.0
libtpu: 0.0.40
codegen_flags: <defaults>
</compile_context>

<pallas_src>
import jax
import jax.numpy as jnp
from jax.experimental import pallas as pl
from jax.experimental.pallas import tpu as pltpu


# ----------------------------------------------------------------------------
# Kernel 1: edge scores  score = sum(head * rel * tail, axis=-1)
# ----------------------------------------------------------------------------
def _edge_score_kernel(h_ref, r_ref, t_ref, o_ref):
    prod = h_ref[...] * r_ref[...] * t_ref[...]          # elementwise on VPU
    # f32 accumulate regardless of input dtype; lane reduction on the XLU.
    o_ref[...] = jnp.sum(prod.astype(jnp.float32), axis=-1, keepdims=True)


def _edge_row_tile(E, D, vmem_budget_bytes=8 * 1024 * 1024):
    """Rows per tile under a conservative (v7x-safe) VMEM budget.

    Also guarantees >= 2 grid tiles when E allows so both v7x TensorCores get
    work (they share the 3.2 TB/s HBM; both DMA engines are needed for the
    roofline).
    """
    per_row_bytes = 3 * 2 * D * 4     # 3 inputs x 2 pipeline buffers, f32
    te = vmem_budget_bytes // per_row_bytes
    te = int(min(max(te, 8), 2048))
    if te >= E:
        if E > 16:
            te = -(-(E // 2) // 8) * 8   # ~E/2 rounded up to a multiple of 8
        else:
            te = E                       # full extent: always a legal block
    else:
        te = max(8, (te // 8) * 8)       # sublane-aligned
    return te


def distmult_edge_score(head, rel, tail):
    """head, rel, tail: (E, D) -> (E,) float32."""
    E, D = head.shape
    te = _edge_row_tile(E, D)
    grid = (pl.cdiv(E, te),)

    itemsize = jnp.dtype(head.dtype).itemsize
    vmem_needed = 3 * 2 * te * D * itemsize + 2 * te * 4
    vmem_limit = int(min(max(vmem_needed + (4 << 20), 32 << 20), 64 << 20))

    cost = pl.CostEstimate(
        flops=3 * E * D,
        transcendentals=0,
        bytes_accessed=3 * E * D * itemsize + E * 4,
    )

    out = pl.pallas_call(
        _edge_score_kernel,
        out_shape=jax.ShapeDtypeStruct((E, 1), jnp.float32),
        grid_spec=pltpu.PrefetchScalarGridSpec(
            num_scalar_prefetch=0,
            grid=grid,
            in_specs=[
                pl.BlockSpec((te, D), lambda i: (i, 0)),
                pl.BlockSpec((te, D), lambda i: (i, 0)),
                pl.BlockSpec((te, D), lambda i: (i, 0)),
            ],
            # (te, 1) output -> masked stores, but output bytes are ~1/D of
            # input bytes; this kernel is input-BW limited, so leave as-is.
            out_specs=pl.BlockSpec((te, 1), lambda i: (i, 0)),
        ),
        compiler_params=pltpu.CompilerParams(
            dimension_semantics=("parallel",),
            vmem_limit_bytes=vmem_limit),
        cost_estimate=cost,
    )(head, rel, tail)
    return out.reshape(E)


# ----------------------------------------------------------------------------
# Kernel 2: negative-sample scores (create_neg):
#   tmp  = pos_a * rel                               (C, CS, D)
#   out  = bmm(tmp, transpose(neg_b, 1, 2))          (C, CS, NS)
# Grid: (chunk, CS tile, NS tile).
# Staged variant: tmp is computed once per (chunk, CS tile) into VMEM scratch
# under pl.when(j == 0) and reused across NS tiles (NS axis sequential).
# Inline variant (small chunk parallelism, v7x megacore): no scratch, NS axis
# parallel; a*r is recomputed each step (trivially hidden under DMA/MXU).
# ----------------------------------------------------------------------------
def _neg_score_kernel_staged(a_ref, r_ref, nb_ref, o_ref, tmp_ref):
    # a_ref/r_ref/tmp_ref: (TM, D), nb_ref: (TN, D), o_ref: (TM, TN)
    @pl.when(pl.program_id(2) == 0)
    def _():
        tmp_ref[...] = a_ref[...] * r_ref[...]

    o_ref[...] = jax.lax.dot_general(
        tmp_ref[...], nb_ref[...],
        dimension_numbers=(((1,), (1,)), ((), ())),    # contract over D
        preferred_element_type=jnp.float32,
    ).astype(o_ref.dtype)


def _neg_score_kernel_inline(a_ref, r_ref, nb_ref, o_ref):
    tmp = a_ref[...] * r_ref[...]
    o_ref[...] = jax.lax.dot_general(
        tmp, nb_ref[...],
        dimension_numbers=(((1,), (1,)), ((), ())),
        preferred_element_type=jnp.float32,
    ).astype(o_ref.dtype)


def _neg_vmem_bytes(tm, tn, dim, op_bytes, out_bytes):
    blk = (2 * tm * dim + tn * dim) * op_bytes + tm * tn * out_bytes
    return 2 * blk + tm * dim * op_bytes   # 2x pipeline buffers + tmp scratch


def _pick_neg_tiles(chunk_size, neg_sample_size, dim, op_bytes, out_bytes,
                    vmem_budget_bytes=28 * 1024 * 1024):
    """Large, lane-dense tiles bounded by a v7x-safe VMEM budget.

    Full-extent blocks are always legal (even for non-8/128-multiple dims);
    sub-extent blocks are kept 8-aligned (tm) / 128-aligned (tn). Grids use
    pl.cdiv, so non-dividing shapes produce partial last blocks instead of
    tiny tiles.
    """
    tm = chunk_size if chunk_size <= 512 else 512
    tn = neg_sample_size if neg_sample_size <= 1024 else 1024

    # Shrink the NS tile first (only adds grid steps), then the CS tile.
    while _neg_vmem_bytes(tm, tn, dim, op_bytes, out_bytes) > vmem_budget_bytes \
            and tn > 128:
        tn = max(128, (tn // 2) // 128 * 128)
    while _neg_vmem_bytes(tm, tn, dim, op_bytes, out_bytes) > vmem_budget_bytes \
            and tm > 64:
        tm = max(64, (tm // 2) // 8 * 8)
    return tm, tn


def distmult_neg_score(pos_a, relations, neg_b, num_chunks, chunk_size,
                       neg_sample_size, use_bf16_operands=False,
                       out_dtype=jnp.float32):
    """pos_a, relations: (C*CS, D); neg_b: (C*NS, D) -> (C, CS, NS) out_dtype."""
    D = pos_a.shape[1]
    operand_dtype = jnp.bfloat16 if use_bf16_operands else pos_a.dtype

    # Wrapper-side cast: reduces HBM streaming bytes of a memory-bound kernel
    # (an in-kernel cast would not). MXU accumulate stays f32 regardless.
    a = pos_a.reshape(num_chunks, chunk_size, D).astype(operand_dtype)
    r = relations.reshape(num_chunks, chunk_size, D).astype(operand_dtype)
    nb = neg_b.reshape(num_chunks, neg_sample_size, D).astype(operand_dtype)

    op_bytes = jnp.dtype(operand_dtype).itemsize
    out_bytes = jnp.dtype(out_dtype).itemsize
    tm, tn = _pick_neg_tiles(chunk_size, neg_sample_size, D, op_bytes, out_bytes)
    n_cs = pl.cdiv(chunk_size, tm)
    n_ns = pl.cdiv(neg_sample_size, tn)
    grid = (num_chunks, n_cs, n_ns)

    # Staged variant needs the NS axis sequential ("arbitrary"). If the chunk
    # / CS-tile axes cannot feed two v7x TensorCores, recompute a*r inline and
    # let the NS axis shard across cores instead.
    staged = (num_chunks * n_cs) >= 2

    vmem_needed = _neg_vmem_bytes(tm, tn, D, op_bytes, out_bytes)
    vmem_limit = int(min(max(vmem_needed + (4 << 20), 32 << 20), 64 << 20))

    cost = pl.CostEstimate(
        flops=2 * num_chunks * chunk_size * neg_sample_size * D
              + num_chunks * chunk_size * D,
        transcendentals=0,
        bytes_accessed=(2 * num_chunks * chunk_size * D * op_bytes          # a, r
                        + num_chunks * n_cs * neg_sample_size * D * op_bytes  # nb re-read per CS tile
                        + num_chunks * chunk_size * neg_sample_size * out_bytes),
    )

    in_specs = [
        # Leading chunk dim squeezed out of the kernel view.
        pl.BlockSpec((None, tm, D), lambda c, i, j: (c, i, 0)),
        pl.BlockSpec((None, tm, D), lambda c, i, j: (c, i, 0)),
        pl.BlockSpec((None, tn, D), lambda c, i, j: (c, j, 0)),
    ]
    out_spec = pl.BlockSpec((None, tm, tn), lambda c, i, j: (c, i, j))

    if staged:
        kernel = _neg_score_kernel_staged
        scratch = [pltpu.VMEM((tm, D), operand_dtype)]
        semantics = ("parallel", "parallel", "arbitrary")
    else:
        kernel = _neg_score_kernel_inline
        scratch = []
        semantics = ("parallel", "parallel", "parallel")

    return pl.pallas_call(
        kernel,
        out_shape=jax.ShapeDtypeStruct(
            (num_chunks, chunk_size, neg_sample_size), out_dtype),
        grid_spec=pltpu.PrefetchScalarGridSpec(
            num_scalar_prefetch=0,
            grid=grid,
            in_specs=in_specs,
            out_specs=out_spec,
            scratch_shapes=scratch,
        ),
        compiler_params=pltpu.CompilerParams(
            dimension_semantics=semantics,
            vmem_limit_bytes=vmem_limit),
        cost_estimate=cost,
    )(a, r, nb)


def distmult_create_neg(neg_head, use_bf16_operands=False,
                        out_dtype=jnp.float32):
    """Mirror of DistMultScore.create_neg(neg_head).

    use_bf16_operands / out_dtype plumb the memory-traffic options through the
    public path (enable on v6e/v7x when downstream tolerates bf16 logits).
    """
    if neg_head:
        def fn(heads, relations, tails, num_chunks, chunk_size,
               neg_sample_size):
            return distmult_neg_score(tails, relations, heads,
                                      num_chunks, chunk_size, neg_sample_size,
                                      use_bf16_operands=use_bf16_operands,
                                      out_dtype=out_dtype)
    else:
        def fn(heads, relations, tails, num_chunks, chunk_size,
               neg_sample_size):
            return distmult_neg_score(heads, relations, tails,
                                      num_chunks, chunk_size, neg_sample_size,
                                      use_bf16_operands=use_bf16_operands,
                                      out_dtype=out_dtype)
    return fn


if __name__ == "__main__":
    key = jax.random.PRNGKey(0)
    keys = jax.random.split(key, 8)

    # --- edge_func path: E edges, hidden dim D (tiled over E) ---
    E, D = 1024, 128
    head = jax.random.normal(keys[0], (E, D), dtype=jnp.float32)
    rel = jax.random.normal(keys[1], (E, D), dtype=jnp.float32)
    tail = jax.random.normal(keys[2], (E, D), dtype=jnp.float32)

    score = distmult_edge_score(head, rel, tail)
    jax.block_until_ready(score)
    ref = jnp.sum(head * rel * tail, axis=-1)
    assert jnp.allclose(score, ref, atol=1e-3, rtol=1e-3)

    # --- create_neg (negative tails, neg_head=False), MXU-aligned shapes ---
    num_chunks, chunk_size, neg_sample_size = 2, 128, 256
    heads_pos = jax.random.normal(keys[3], (num_chunks * chunk_size, D),
                                  dtype=jnp.float32)
    rels_pos = jax.random.normal(keys[4], (num_chunks * chunk_size, D),
                                 dtype=jnp.float32)
    neg_tails = jax.random.normal(keys[5], (num_chunks * neg_sample_size, D),
                                  dtype=jnp.float32)

    neg_fn = distmult_create_neg(neg_head=False)
    neg_score = neg_fn(heads_pos, rels_pos, neg_tails,
                       num_chunks, chunk_size, neg_sample_size)
    jax.block_until_ready(neg_score)
    ref_neg = jnp.einsum(
        "ced,cnd->cen",
        (heads_pos * rels_pos).reshape(num_chunks, chunk_size, D),
        neg_tails.reshape(num_chunks, neg_sample_size, D))
    assert jnp.allclose(neg_score, ref_neg, atol=1e-3, rtol=1e-3)

    # --- create_neg (negative heads, neg_head=True) ---
    tails_pos = jax.random.normal(keys[6], (num_chunks * chunk_size, D),
                                  dtype=jnp.float32)
    neg_heads = jax.random.normal(keys[7], (num_chunks * neg_sample_size, D),
                                  dtype=jnp.float32)

    neg_fn_h = distmult_create_neg(neg_head=True)
    neg_score_h = neg_fn_h(neg_heads, rels_pos, tails_pos,
                           num_chunks, chunk_size, neg_sample_size)
    jax.block_until_ready(neg_score_h)
    ref_neg_h = jnp.einsum(
        "ced,cnd->cen",
        (tails_pos * rels_pos).reshape(num_chunks, chunk_size, D),
        neg_heads.reshape(num_chunks, neg_sample_size, D))
    assert jnp.allclose(neg_score_h, ref_neg_h, atol=1e-3, rtol=1e-3)

    # --- non-128-multiple CS / NS (exercises cdiv / full-extent tile path) ---
    C2, CS2, NS2 = 2, 96, 200
    hp2 = jax.random.normal(keys[0], (C2 * CS2, D), dtype=jnp.float32)
    rp2 = jax.random.normal(keys[1], (C2 * CS2, D), dtype=jnp.float32)
    nt2 = jax.random.normal(keys[2], (C2 * NS2, D), dtype=jnp.float32)
    out2 = distmult_neg_score(hp2, rp2, nt2, C2, CS2, NS2)
    jax.block_until_ready(out2)
    ref2 = jnp.einsum("ced,cnd->cen",
                      (hp2 * rp2).reshape(C2, CS2, D),
                      nt2.reshape(C2, NS2, D))
    assert jnp.allclose(out2, ref2, atol=1e-3, rtol=1e-3)

    # --- bf16 streamed-operand path (memory-traffic win on v6e/v7x) ---
    out_bf = distmult_neg_score(heads_pos, rels_pos, neg_tails,
                                num_chunks, chunk_size, neg_sample_size,
                                use_bf16_operands=True)
    jax.block_until_ready(out_bf)
    assert float(jnp.max(jnp.abs(out_bf.astype(jnp.float32) - ref_neg))) < 1.0

    print("KERNEL_OK")
</pallas_src>

<mosaic_0001>
module attributes {stable_mosaic.version = 11 : i64} {
  func.func @_edge_score_kernel(%arg0: i32, %arg1: memref<512x128xf32, #tpu.memory_space<vmem>>, %arg2: memref<512x128xf32, #tpu.memory_space<vmem>>, %arg3: memref<512x128xf32, #tpu.memory_space<vmem>>, %arg4: memref<512x1xf32, #tpu.memory_space<vmem>>) attributes {dimension_semantics = [#tpu.dimension_semantics<parallel>], iteration_bounds = array<i64: 2>, scalar_prefetch = 0 : i64, scratch_operands = 0 : i64, tpu.core_type = #tpu.core_type<tc>, window_params = [{transform_indices = @transform_0, window_bounds = array<i64: 512, 128>}, {transform_indices = @transform_1, window_bounds = array<i64: 512, 128>}, {transform_indices = @transform_2, window_bounds = array<i64: 512, 128>}, {transform_indices = @transform_3, window_bounds = array<i64: 512, 1>}]} {
    %c0 = arith.constant 0 : index
    %c0_0 = arith.constant 0 : index
    %0 = vector.load %arg1[%c0, %c0_0] : memref<512x128xf32, #tpu.memory_space<vmem>>, vector<512x128xf32>
    %c0_1 = arith.constant 0 : index
    %c0_2 = arith.constant 0 : index
    %1 = vector.load %arg2[%c0_1, %c0_2] : memref<512x128xf32, #tpu.memory_space<vmem>>, vector<512x128xf32>
    %2 = arith.mulf %0, %1 : vector<512x128xf32>
    %c0_3 = arith.constant 0 : index
    %c0_4 = arith.constant 0 : index
    %3 = vector.load %arg3[%c0_3, %c0_4] : memref<512x128xf32, #tpu.memory_space<vmem>>, vector<512x128xf32>
    %4 = arith.mulf %2, %3 : vector<512x128xf32>
    %cst = arith.constant dense<0.000000e+00> : vector<512xf32>
    %5 = vector.multi_reduction <add>, %4, %cst [1] : vector<512x128xf32> to vector<512xf32>
    %6 = vector.shape_cast %5 : vector<512xf32> to vector<512x1xf32>
    %c0_5 = arith.constant 0 : index
    %c0_6 = arith.constant 0 : index
    %7 = vector.load %arg4[%c0_5, %c0_6] : memref<512x1xf32, #tpu.memory_space<vmem>>, vector<512x1xf32>
    tpu.vector_store %arg4[%c0_5, %c0_6], %6 {strides = array<i32>} : memref<512x1xf32, #tpu.memory_space<vmem>>, vector<512x1xf32>,
    return
  }
  func.func @transform_0(%arg0: i32) -> (i32, i32) {
    %c0_i32 = arith.constant 0 : i32
    %c0_i32_0 = arith.constant 0 : i32
    return %arg0, %c0_i32 : i32, i32
  }
  func.func @transform_1(%arg0: i32) -> (i32, i32) {
    %c0_i32 = arith.constant 0 : i32
    %c0_i32_0 = arith.constant 0 : i32
    return %arg0, %c0_i32 : i32, i32
  }
  func.func @transform_2(%arg0: i32) -> (i32, i32) {
    %c0_i32 = arith.constant 0 : i32
    %c0_i32_0 = arith.constant 0 : i32
    return %arg0, %c0_i32 : i32, i32
  }
  func.func @transform_3(%arg0: i32) -> (i32, i32) {
    %c0_i32 = arith.constant 0 : i32
    %c0_i32_0 = arith.constant 0 : i32
    return %arg0, %c0_i32 : i32, i32
  }
}

</mosaic_0001>

<bundles_post_ra>
// kernel: tpu_custom_call.1
= control target key start
LH: loop header
LB: loop body
LE: loop exit
PB: predicated region body
PF: predicated region fallthrough
CT: control target
= control target key end

     0   :  { %8 = vsyncpa [#allocation3], 0  ;;  %s1641_s0 = inlined_call_operand.hbm [shape: f32[1024,128], index: 0, kind: input, shape index: {}]   ;;  %s1642_s1 = inlined_call_operand.hbm [shape: f32[1024,128], index: 1, kind: input, shape index: {}]   ;;  %s1643_s2 = inlined_call_operand.hbm [shape: f32[1024,128], index: 2, kind: input, shape index: {}]   ;;  %s1644_s3 = inlined_call_operand.vmem [shape: f32[1024,1], index: 3, kind: output, shape index: {}]  }
   0x1   :  { %10 = vsyncpa [#allocation3 + $0x1], 0 }
   0x2   :  { %11 = vsyncpa [#allocation5], 0 }
   0x3   :  { %13 = vsyncpa [#allocation5 + $0x1], 0  ;;  %s1119_s12 = smov 0   ;;  %s1121_s13 = smov 0  }
   0x4   :  { %s1123_s14 = smov 0   ;;  %s1125_s15 = smov 0  }
   0x5 LB: > { %s1138_s16 = sadd.s32 4294967295, %s1092_s15   ;;  %s1141_s17 = sadd.s32 1, %s1092_s15   ;;  %s1092_s15 = sphi %s1125_s15, %s1657_s15   ;;  %s1088_s14 = sphi %s1123_s14, %s1656_s14   ;;  %s1084_s13 = sphi %s1121_s13, %s1655_s13   ;;  %s1080_s12 = sphi %s1119_s12, %s1654_s12  }
   0x6   : > { %s23_s18 = ssub.s32 %s1092_s15, %s1141_s17  ;;  %s26_s19 = sadd.s32 1, %s1088_s14 }
   0x7   : > { %p24_p0 = scmp.eq.s32.totalorder %s23_s18, 0  ;;  %p33_p1 = scmp.ne.s32.totalorder %s1088_s14, %s1084_s13 }
   0x8   : > { %p34_p2 = scmp.eq.s32.totalorder %s1092_s15, 0  ;;  %p39_p3 = scmp.ne.s32.totalorder %s1084_s13, %s1080_s12 }
   0x9   : > { %s1151_s20 = scalar_select %p24_p0, %s1088_s14, %s26_s19  }
   0xa   : > { %p35_p4 = por %p34_p2, %p33_p1  ;;  %p40_p5 = scmp.eq.s32.totalorder %s1138_s16, 0 }
   0xb   : > { %p935_p6 = scmp.lt.s32.totalorder %s1092_s15, 2  ;;  %s141_s22 = sand.u32 1, %s1088_s14  }
   0xc   : > { %p1155_p7 = por %p40_p5, %p39_p3  ;;  %s1162_s23 = sshll.u32 %s141_s22, 9 }
   0xd   : > { %s1165_s24 = sshll.u32 %s1092_s15, 13  ;;  %p1167_p8 = pnand %p935_p6, %p35_p4 }
   0xe   : > { %s1646_s21 = scalar_select %p1155_p7, 1, 0 }
   0xf   : > { %s162_s26 = sand.u32 1, %s1092_s15   ;;  %s1176_s29 = scalar_lea.hbm %s1642_s1, %s1165_s24 }
  0x10   : > { %s166_s30 = scalar_lea.vmem [#allocation4], %s1162_s23  ;;  %s1183_s5 = scalar_lea.sflag [#allocation5], %s162_s26 }
  0x11   : > { %s173_s4 = sshll.u32 %s166_s30, 4  ;;  %s970_s6 = scalar_lea.hbm %s1176_s29, 8192  ;;  %s1180_s4 = int_to_ptr.vmem [resolvable:$true] %s173_s4 }
  0x12   : > { %p971_p11 = scmp.ne.s32.totalorder %s1176_s29, %s970_s6  ;;  %p1189_p12 = pneg %p1167_p8 }
  0x13   : > { %s975_s10 = scalar_lea.hbm %s1642_s1, 16384  ;;  %p976_p1 = scmp.lt.s32.totalorder %s1176_s29, %s1642_s1 }
  0x14   : > { %p973_p13 = pnand %p1189_p12, %p971_p11  ;;  %p977_p2 = scmp.lt.s32.totalorder %s975_s10, %s970_s6 }
  0x16   : > { %p974_p0 = pneg %p973_p13  ;;  %p978_p3 = por %p977_p2, %p976_p1 }
  0x18   : > { %p979_p4 = pnand %p978_p3, %p974_p0 }
  0x1a   : > { %982 = shalt.err (!%p979_p4)
}
  0x1b   : > { %s983_s18 = scalar_lea.vmem %s1180_s4, 8192  ;;  %s1094_s19 = smov [#allocation4]  }
  0x1c   : > { %p984_p5 = scmp.ne.s32.totalorder %s1180_s4, %s983_s18  ;;  %s988_s26 = sshll.u32 %s1094_s19, 4  ;;  %s989_s26 = int_to_ptr.vmem [resolvable:$false] %s988_s26 }
  0x1d   : > { %s990_s27 = scalar_lea.vmem %s989_s26, 16384  ;;  %p991_p13 = scmp.lt.s32.totalorder %s1180_s4, %s989_s26 }
  0x1e   : > { %p986_p6 = pnand %p984_p5, %p1189_p12  ;;  %p992_p9 = scmp.lt.s32.totalorder %s990_s27, %s983_s18 }
  0x20   : > { %p987_p11 = pneg %p986_p6  ;;  %p993_p10 = por %p992_p9, %p991_p13 }
  0x22   : > { %p994_p7 = pnand %p993_p10, %p987_p11 }
  0x24   : > { %997 = shalt.err (!%p994_p7)
}
  0x25   : > { %s1095_s28 = smov 128   ;;  %s1096_s30 = smov 8  }
  0x26   : > { %931 = dma.hbm_to_vmem [thread:$0]  (!%p1167_p8), %s1176_s29, 8192, %s1180_s4, %s1183_s5, %s1095_s28, %s1095_s28, %s1096_s30  }
  0x27   : > { %p1649_p9 = scmp.lt.s32.totalorder %s1092_s15, 3  ;;  %p1650_p7 = scmp.ge.s32.totalorder %s1092_s15, 1 }
  0x28   : > { %s1227_s10 = scalar_lea.hbm %s1641_s0, %s1165_s24  ;;  %s145_s11 = scalar_lea.vmem [#allocation2], %s1162_s23 }
  0x29   : > { %p1219_p10 = pnand %p1650_p7, %p1649_p9  ;;  %s152_s12 = sshll.u32 %s145_s11, 4  ;;  %s1230_s12 = int_to_ptr.vmem [resolvable:$true] %s152_s12 }
  0x2a   : > { %s1236_s15 = scalar_lea.hbm %s1643_s2, %s1165_s24  ;;  %s142_s4 = scalar_lea.sflag [#allocation3], %s141_s22 }
  0x2b   : > { %s1651_s6 = scalar_select %p1219_p10, 1, 0 }
  0x2c   : > { %s998_s19 = scalar_lea.hbm %s1227_s10, 8192  ;;  %s1003_s8 = scalar_lea.hbm %s1641_s0, 16384 }
  0x2d   : > { %p999_p0 = scmp.ne.s32.totalorder %s1227_s10, %s998_s19  ;;  %p1004_p3 = scmp.lt.s32.totalorder %s1227_s10, %s1641_s0 }
  0x2e   : > { %p1005_p4 = scmp.lt.s32.totalorder %s1003_s8, %s998_s19 }
  0x2f   : > { %p1001_p1 = pnand %p999_p0, %p1189_p12 }
  0x30   : > { %p1006_p5 = por %p1005_p4, %p1004_p3 }
  0x31   : > { %p1002_p2 = pneg %p1001_p1 }
  0x33   : > { %p1007_p6 = pnand %p1006_p5, %p1002_p2 }
  0x35   : > { %1010 = shalt.err (!%p1007_p6)
}
  0x36   : > { %s1011_s22 = scalar_lea.vmem %s1230_s12, 8192  ;;  %s1097_s24 = smov [#allocation2]  }
  0x37   : > { %p1012_p11 = scmp.ne.s32.totalorder %s1230_s12, %s1011_s22  ;;  %s1016_s18 = sshll.u32 %s1097_s24, 4  ;;  %s1017_s18 = int_to_ptr.vmem [resolvable:$false] %s1016_s18 }
  0x38   : > { %s1018_s29 = scalar_lea.vmem %s1017_s18, 16384  ;;  %p1019_p7 = scmp.lt.s32.totalorder %s1230_s12, %s1017_s18 }
  0x39   : > { %p1014_p13 = pnand %p1012_p11, %p1189_p12  ;;  %p1020_p0 = scmp.lt.s32.totalorder %s1018_s29, %s1011_s22 }
  0x3b   : > { %p1015_p9 = pneg %p1014_p13  ;;  %p1021_p1 = por %p1020_p0, %p1019_p7 }
  0x3d   : > { %p1022_p10 = pnand %p1021_p1, %p1015_p9 }
  0x3f   : > { %1025 = shalt.err (!%p1022_p10)
}
  0x40   : > { %928 = dma.hbm_to_vmem [thread:$0]  (!%p1167_p8), %s1227_s10, 8192, %s1230_s12, %s142_s4, %s1095_s28, %s1095_s28, %s1096_s30  }
  0x41   : > { %s187_s19 = scalar_lea.vmem [#allocation6], %s1162_s23  ;;  %s1026_s27 = scalar_lea.hbm %s1236_s15, 8192 }
  0x42   : > { %s194_s26 = sshll.u32 %s187_s19, 4  ;;  %p1027_p2 = scmp.ne.s32.totalorder %s1236_s15, %s1026_s27  ;;  %s195_s26 = int_to_ptr.vmem [resolvable:$true] %s194_s26 }
  0x43   : > { %s1031_s11 = scalar_lea.hbm %s1643_s2, 16384  ;;  %p1032_p4 = scmp.lt.s32.totalorder %s1236_s15, %s1643_s2 }
  0x44   : > { %p1029_p10 = pnand %p1027_p2, %p1189_p12  ;;  %p1033_p5 = scmp.lt.s32.totalorder %s1031_s11, %s1026_s27 }
  0x46   : > { %p1030_p3 = pneg %p1029_p10  ;;  %p1034_p6 = por %p1033_p5, %p1032_p4 }
  0x48   : > { %p1035_p11 = pnand %p1034_p6, %p1030_p3 }
  0x4a   : > { %1038 = shalt.err (!%p1035_p11)
}
  0x4b   : > { %s1039_s23 = scalar_lea.vmem %s195_s26, 8192  ;;  %s1098_s10 = smov [#allocation6]  }
  0x4c   : > { %p1040_p13 = scmp.ne.s32.totalorder %s195_s26, %s1039_s23  ;;  %s1044_s12 = sshll.u32 %s1098_s10, 4  ;;  %s1045_s12 = int_to_ptr.vmem [resolvable:$false] %s1044_s12 }
  0x4d   : > { %s1046_s4 = scalar_lea.vmem %s1045_s12, 16384  ;;  %p1047_p0 = scmp.lt.s32.totalorder %s195_s26, %s1045_s12 }
  0x4e   : > { %p1042_p9 = pnand %p1040_p13, %p1189_p12  ;;  %p1048_p1 = scmp.lt.s32.totalorder %s1046_s4, %s1039_s23 }
  0x50   : > { %p1043_p7 = pneg %p1042_p9  ;;  %p1049_p2 = por %p1048_p1, %p1047_p0 }
  0x52   : > { %p1050_p10 = pnand %p1049_p2, %p1043_p7 }
  0x54   : > { %1053 = shalt.err (!%p1050_p10)
}
  0x55   : > { %934 = dma.hbm_to_vmem [thread:$0]  (!%p1167_p8), %s1236_s15, 8192, %s195_s26, %s1183_s5, %s1095_s28, %s1095_s28, %s1096_s30  }
  0x56   : > { %p1652_p12 = scmp.ne.s32.totalorder %s1651_s6, 0 }
  0x57   : > { %s208_s7 = sand.u32 (!%p1652_p12), 1, %s1084_s13   ;;  %p1653_p3 = scmp.ne.s32.totalorder (!%p1652_p12), %s1646_s21, 0 }
  0x58   : > { %206 = sbr.rel (%p1652_p12) target bundleno = 366 (0x16e), region = 32  ;;  %s909_s18 = sshll.u32 (!%p1652_p12), %s208_s7, 9 }
  0x59   : > { %s209_s29 = scalar_lea.sflag (!%p1652_p12), [#allocation3], %s208_s7  ;;  %s1287_s19 = scalar_lea.vmem (!%p1652_p12), [#allocation2], %s909_s18 }
  0x5d   : > { %1071 = dma.done.wait (%p1653_p3), %s209_s29, 8192  }
  0x5e   : > { %1073 = vsyncadd (%p1653_p3), %s209_s29, 4294959104  ;;  %s217_s25 = sand.u32 1, %s1138_s16   ;;  %s1294_s5 = scalar_lea.vmem [#allocation4], %s909_s18 }
  0x5f   : > { %s218_s27 = scalar_lea.sflag [#allocation5], %s217_s25 }
  0x60   : > { %1075 = dma.done.wait (%p1653_p3), %s218_s27, 16384  }
  0x61   : > { %1077 = vsyncadd (%p1653_p3), %s218_s27, 4294950912  ;;  %v274_v0 = vld [vmem:[%s1287_s19 + $0x10] sm:$0xff]  ;;  %s1302_s28 = scalar_lea.vmem [#allocation6], %s909_s18  ;;  %v272_v4 = vld [vmem:[%s1287_s19] sm:$0xff]  ;;  %s912_s21 = sshll.u32 %s1138_s16, 6  ;;  %vm720_vm0 = vcmask 7168  }
  0x62   : > { %v338_v1 = vld [vmem:[%s1294_s5 + $0x10] sm:$0xff]  ;;  %v336_v5 = vld [vmem:[%s1294_s5] sm:$0xff]  ;;  %v275_v8 = vld [vmem:[%s1287_s19 + $0x18] sm:$0xff]  ;;  %p267_p8 = scmp.lt.s32.totalorder %s912_s21, 127 }
  0x63   : > { %v466_v2 = vld [vmem:[%s1302_s28 + $0x10] sm:$0xff]  ;;  %v402_v3 = vmul.f32 %v338_v1, %v274_v0  ;;  %v464_v6 = vld [vmem:[%s1302_s28] sm:$0xff]  ;;  %v400_v7 = vmul.f32 %v336_v5, %v272_v4  ;;  %v339_v9 = vld [vmem:[%s1294_s5 + $0x18] sm:$0xff] }
  0x64   : > { %v467_v10 = vld [vmem:[%s1302_s28 + $0x18] sm:$0xff]  ;;  %v403_v12 = vmul.f32 %v339_v9, %v275_v8  ;;  %v273_v13 = vld [vmem:[%s1287_s19 + $0x8] sm:$0xff]  ;;  %v276_v22 = vld [vmem:[%s1287_s19 + $0x20] sm:$0xff]  ;;  %s1659_s21 = smov (!%p267_p8, %s912_s21), 127 }
  0x65   : > { %v530_v11 = vmul.f32 %v466_v2, %v402_v3  ;;  %v337_v14 = vld [vmem:[%s1294_s5 + $0x8] sm:$0xff]  ;;  %v528_v16 = vmul.f32 %v464_v6, %v400_v7  ;;  %v340_v23 = vld [vmem:[%s1294_s5 + $0x20] sm:$0xff]  ;;  %v279_v27 = vld [vmem:[%s1287_s19 + $0x38] sm:$0xff]  ;;  %s913_s30 = sshll.u32 %s1659_s21, 3 }
  0x66   : > { %v465_v15 = vld [vmem:[%s1302_s28 + $0x8] sm:$0xff]  ;;  %v401_v17 = vmul.f32 %v337_v14, %v273_v13  ;;  %v531_v20 = vmul.f32 %v467_v10, %v403_v12  ;;  %v404_v26 = vmul.f32 %v340_v23, %v276_v22  ;;  %v343_v28 = vld [vmem:[%s1294_s5 + $0x38] sm:$0xff]  ;;  %v468_v29 = vld [vmem:[%s1302_s28 + $0x20] sm:$0xff]  ;;  %s1498_s26 = scalar_lea.vmem %s1644_s3, %s913_s30 }
  0x67   : > { %v277_v18 = vld [vmem:[%s1287_s19 + $0x28] sm:$0xff]  ;;  %596 = vadd.xlane.f32.xlu1 %v530_v11  ;;  %592 = vadd.xlane.f32.xlu0 %v528_v16  ;;  %v278_v30 = vld [vmem:[%s1287_s19 + $0x30] sm:$0xff]  ;;  %v407_v33 = vmul.f32 %v343_v28, %v279_v27  ;;  %v471_v35 = vld [vmem:[%s1302_s28 + $0x38] sm:$0xff] }
  0x68   : > { %v341_v19 = vld [vmem:[%s1294_s5 + $0x28] sm:$0xff]  ;;  %v529_v24 = vmul.f32 %v465_v15, %v401_v17  ;;  %v342_v31 = vld [vmem:[%s1294_s5 + $0x30] sm:$0xff]  ;;  %v532_v34 = vmul.f32 %v468_v29, %v404_v26  ;;  %v280_v40 = vld [vmem:[%s1287_s19 + $0x40] sm:$0xff] }
  0x69   : > { %v405_v21 = vmul.f32 %v341_v19, %v277_v18  ;;  %v469_v25 = vld [vmem:[%s1302_s28 + $0x28] sm:$0xff]  ;;  %v406_v36 = vmul.f32 %v342_v31, %v278_v30  ;;  %v470_v39 = vld [vmem:[%s1302_s28 + $0x30] sm:$0xff]  ;;  %v344_v41 = vld [vmem:[%s1294_s5 + $0x40] sm:$0xff]  ;;  %v535_v42 = vmul.f32 %v471_v35, %v407_v33 }
  0x6a   : > { %v281_v37 = vld [vmem:[%s1287_s19 + $0x48] sm:$0xff]  ;;  %v408_v46 = vmul.f32 %v344_v41, %v280_v40  ;;  %v283_v47 = vld [vmem:[%s1287_s19 + $0x58] sm:$0xff]  ;;  %v472_v49 = vld [vmem:[%s1302_s28 + $0x40] sm:$0xff] }
  0x6b   : > { %598 = vadd.xlane.f32.xlu1 %v531_v20  ;;  %v533_v32 = vmul.f32 %v469_v25, %v405_v21  ;;  %594 = vadd.xlane.f32.xlu0 %v529_v24  ;;  %v345_v38 = vld [vmem:[%s1294_s5 + $0x48] sm:$0xff]  ;;  %v534_v44 = vmul.f32 %v470_v39, %v406_v36  ;;  %v347_v48 = vld [vmem:[%s1294_s5 + $0x58] sm:$0xff]  ;;  %v282_v50 = vld [vmem:[%s1287_s19 + $0x50] sm:$0xff] }
  0x6c   : > { %v409_v43 = vmul.f32 %v345_v38, %v281_v37  ;;  %v473_v45 = vld [vmem:[%s1302_s28 + $0x48] sm:$0xff]  ;;  %v346_v51 = vld [vmem:[%s1294_s5 + $0x50] sm:$0xff]  ;;  %v411_v53 = vmul.f32 %v347_v48, %v283_v47  ;;  %v536_v54 = vmul.f32 %v472_v49, %v408_v46  ;;  %v475_v55 = vld [vmem:[%s1302_s28 + $0x58] sm:$0xff] }
  0x6d   : > { %v410_v56 = vmul.f32 %v346_v51, %v282_v50  ;;  %v285_v57 = vld [vmem:[%s1287_s19 + $0x68] sm:$0xff]  ;;  %v474_v59 = vld [vmem:[%s1302_s28 + $0x50] sm:$0xff]  ;;  %v284_v60 = vld [vmem:[%s1287_s19 + $0x60] sm:$0xff] }
  0x6e   : > { %v537_v52 = vmul.f32 %v473_v45, %v409_v43  ;;  %v349_v58 = vld [vmem:[%s1294_s5 + $0x68] sm:$0xff]  ;;  %v348_v61 = vld [vmem:[%s1294_s5 + $0x60] sm:$0xff]  ;;  %v539_v62 = vmul.f32 %v475_v55, %v411_v53  ;;  %v287_v3 = vld [vmem:[%s1287_s19 + $0x78] sm:$0xff] }
  0x6f   : > { %602 = vadd.xlane.f32.xlu1 %v533_v32  ;;  %600 = vadd.xlane.f32.xlu0 %v532_v34  ;;  %v413_v63 = vmul.f32 %v349_v58, %v285_v57  ;;  %v538_v0 = vmul.f32 %v474_v59, %v410_v56  ;;  %v477_v1 = vld [vmem:[%s1302_s28 + $0x68] sm:$0xff]  ;;  %v412_v2 = vmul.f32 %v348_v61, %v284_v60  ;;  %v351_v4 = vld [vmem:[%s1294_s5 + $0x78] sm:$0xff]  ;;  %v476_v5 = vld [vmem:[%s1302_s28 + $0x60] sm:$0xff] }
  0x70   : > { %v286_v6 = vld [vmem:[%s1287_s19 + $0x70] sm:$0xff]  ;;  %v415_v9 = vmul.f32 %v351_v4, %v287_v3  ;;  %v479_v11 = vld [vmem:[%s1302_s28 + $0x78] sm:$0xff]  ;;  %v289_v13 = vld [vmem:[%s1287_s19 + $0x88] sm:$0xff] }
  0x71   : > { %v350_v7 = vld [vmem:[%s1294_s5 + $0x70] sm:$0xff]  ;;  %v541_v8 = vmul.f32 %v477_v1, %v413_v63  ;;  %v540_v10 = vmul.f32 %v476_v5, %v412_v2  ;;  %v353_v14 = vld [vmem:[%s1294_s5 + $0x88] sm:$0xff]  ;;  %v288_v16 = vld [vmem:[%s1287_s19 + $0x80] sm:$0xff] }
  0x72   : > { %v414_v12 = vmul.f32 %v350_v7, %v286_v6  ;;  %v478_v15 = vld [vmem:[%s1302_s28 + $0x70] sm:$0xff]  ;;  %v352_v17 = vld [vmem:[%s1294_s5 + $0x80] sm:$0xff]  ;;  %v543_v18 = vmul.f32 %v479_v11, %v415_v9  ;;  %v417_v19 = vmul.f32 %v353_v14, %v289_v13  ;;  %v481_v21 = vld [vmem:[%s1302_s28 + $0x88] sm:$0xff] }
  0x73   : > { %606 = vadd.xlane.f32.xlu1 %v535_v42  ;;  %604 = vadd.xlane.f32.xlu0 %v534_v44  ;;  %v416_v22 = vmul.f32 %v352_v17, %v288_v16  ;;  %v291_v23 = vld [vmem:[%s1287_s19 + $0x98] sm:$0xff]  ;;  %v480_v25 = vld [vmem:[%s1302_s28 + $0x80] sm:$0xff]  ;;  %v290_v26 = vld [vmem:[%s1287_s19 + $0x90] sm:$0xff] }
  0x74   : > { %v542_v20 = vmul.f32 %v478_v15, %v414_v12  ;;  %v355_v24 = vld [vmem:[%s1294_s5 + $0x98] sm:$0xff]  ;;  %v354_v27 = vld [vmem:[%s1294_s5 + $0x90] sm:$0xff]  ;;  %v545_v28 = vmul.f32 %v481_v21, %v417_v19  ;;  %v293_v33 = vld [vmem:[%s1287_s19 + $0xa8] sm:$0xff] }
  0x75   : > { %v419_v29 = vmul.f32 %v355_v24, %v291_v23  ;;  %v544_v30 = vmul.f32 %v480_v25, %v416_v22  ;;  %v483_v31 = vld [vmem:[%s1302_s28 + $0x98] sm:$0xff]  ;;  %v418_v32 = vmul.f32 %v354_v27, %v290_v26  ;;  %v357_v34 = vld [vmem:[%s1294_s5 + $0xa8] sm:$0xff]  ;;  %v482_v35 = vld [vmem:[%s1302_s28 + $0x90] sm:$0xff] }
  0x76   : > { %v292_v36 = vld [vmem:[%s1287_s19 + $0xa0] sm:$0xff]  ;;  %v421_v39 = vmul.f32 %v357_v34, %v293_v33  ;;  %v485_v41 = vld [vmem:[%s1302_s28 + $0xa8] sm:$0xff]  ;;  %v295_v43 = vld [vmem:[%s1287_s19 + $0xb8] sm:$0xff] }
  0x77   : > { %610 = vadd.xlane.f32.xlu1 %v537_v52  ;;  %608 = vadd.xlane.f32.xlu0 %v536_v54  ;;  %v356_v37 = vld [vmem:[%s1294_s5 + $0xa0] sm:$0xff]  ;;  %v547_v38 = vmul.f32 %v483_v31, %v419_v29  ;;  %v546_v40 = vmul.f32 %v482_v35, %v418_v32  ;;  %v359_v44 = vld [vmem:[%s1294_s5 + $0xb8] sm:$0xff]  ;;  %v294_v46 = vld [vmem:[%s1287_s19 + $0xb0] sm:$0xff] }
  0x78   : > { %v420_v42 = vmul.f32 %v356_v37, %v292_v36  ;;  %v484_v45 = vld [vmem:[%s1302_s28 + $0xa0] sm:$0xff]  ;;  %v358_v47 = vld [vmem:[%s1294_s5 + $0xb0] sm:$0xff]  ;;  %v549_v48 = vmul.f32 %v485_v41, %v421_v39  ;;  %v423_v49 = vmul.f32 %v359_v44, %v295_v43  ;;  %v487_v51 = vld [vmem:[%s1302_s28 + $0xb8] sm:$0xff] }
  0x79   : > { %v422_v52 = vmul.f32 %v358_v47, %v294_v46  ;;  %v297_v53 = vld [vmem:[%s1287_s19 + $0xc8] sm:$0xff]  ;;  %v486_v55 = vld [vmem:[%s1302_s28 + $0xb0] sm:$0xff]  ;;  %v296_v56 = vld [vmem:[%s1287_s19 + $0xc0] sm:$0xff] }
  0x7a   : > { %v548_v50 = vmul.f32 %v484_v45, %v420_v42  ;;  %v361_v54 = vld [vmem:[%s1294_s5 + $0xc8] sm:$0xff]  ;;  %v360_v57 = vld [vmem:[%s1294_s5 + $0xc0] sm:$0xff]  ;;  %v551_v58 = vmul.f32 %v487_v51, %v423_v49  ;;  %v299_v63 = vld [vmem:[%s1287_s19 + $0xd8] sm:$0xff] }
  0x7b   : > { %614 = vadd.xlane.f32.xlu1 %v539_v62  ;;  %612 = vadd.xlane.f32.xlu0 %v538_v0  ;;  %v425_v59 = vmul.f32 %v361_v54, %v297_v53  ;;  %v550_v60 = vmul.f32 %v486_v55, %v422_v52  ;;  %v489_v61 = vld [vmem:[%s1302_s28 + $0xc8] sm:$0xff]  ;;  %v424_v62 = vmul.f32 %v360_v57, %v296_v56  ;;  %v363_v0 = vld [vmem:[%s1294_s5 + $0xd8] sm:$0xff]  ;;  %v488_v1 = vld [vmem:[%s1302_s28 + $0xc0] sm:$0xff] }
  0x7c   : > { %v298_v2 = vld [vmem:[%s1287_s19 + $0xd0] sm:$0xff]  ;;  %v427_v5 = vmul.f32 %v363_v0, %v299_v63  ;;  %v491_v7 = vld [vmem:[%s1302_s28 + $0xd8] sm:$0xff]  ;;  %v301_v9 = vld [vmem:[%s1287_s19 + $0xe8] sm:$0xff] }
  0x7d   : > { %v362_v3 = vld [vmem:[%s1294_s5 + $0xd0] sm:$0xff]  ;;  %v553_v4 = vmul.f32 %v489_v61, %v425_v59  ;;  %v552_v6 = vmul.f32 %v488_v1, %v424_v62  ;;  %v300_v12 = vld [vmem:[%s1287_s19 + $0xe0] sm:$0xff]  ;;  %v493_v17 = vld [vmem:[%s1302_s28 + $0xe8] sm:$0xff] }
  0x7e   : > { %v490_v11 = vld [vmem:[%s1302_s28 + $0xd0] sm:$0xff]  ;;  %v364_v13 = vld [vmem:[%s1294_s5 + $0xe0] sm:$0xff]  ;;  %v555_v14 = vmul.f32 %v491_v7, %v427_v5  ;;  %v303_v19 = vld [vmem:[%s1287_s19 + $0xf8] sm:$0xff] }
  0x7f   : > { %618 = vadd.xlane.f32.xlu1 %v541_v8  ;;  %616 = vadd.xlane.f32.xlu0 %v540_v10  ;;  %v426_v8 = vmul.f32 %v362_v3, %v298_v2  ;;  %v365_v10 = vld [vmem:[%s1294_s5 + $0xe8] sm:$0xff]  ;;  %v492_v21 = vld [vmem:[%s1302_s28 + $0xe0] sm:$0xff]  ;;  %v302_v22 = vld [vmem:[%s1287_s19 + $0xf0] sm:$0xff] }
  0x80   : > { %v429_v15 = vmul.f32 %v365_v10, %v301_v9  ;;  %v366_v23 = vld [vmem:[%s1294_s5 + $0xf0] sm:$0xff]  ;;  %v495_v27 = vld [vmem:[%s1302_s28 + $0xf8] sm:$0xff]  ;;  %v305_v29 = vld [vmem:[%s1287_s19 + $0x108] sm:$0xff] }
  0x81   : > { %v554_v16 = vmul.f32 %v490_v11, %v426_v8  ;;  %v494_v31 = vld [vmem:[%s1302_s28 + $0xf0] sm:$0xff]  ;;  %v304_v32 = vld [vmem:[%s1287_s19 + $0x100] sm:$0xff]  ;;  %v497_v37 = vld [vmem:[%s1302_s28 + $0x108] sm:$0xff] }
  0x82   : > { %v557_v24 = vmul.f32 %v493_v17, %v429_v15  ;;  %v368_v33 = vld [vmem:[%s1294_s5 + $0x100] sm:$0xff]  ;;  %v307_v39 = vld [vmem:[%s1287_s19 + $0x118] sm:$0xff]  ;;  %v306_v42 = vld [vmem:[%s1287_s19 + $0x110] sm:$0xff] }
  0x83   : > { %622 = vadd.xlane.f32.xlu1 %v543_v18  ;;  %620 = vadd.xlane.f32.xlu0 %v542_v20  ;;  %v428_v18 = vmul.f32 %v364_v13, %v300_v12  ;;  %v367_v20 = vld [vmem:[%s1294_s5 + $0xf8] sm:$0xff]  ;;  %v496_v41 = vld [vmem:[%s1302_s28 + $0x100] sm:$0xff]  ;;  %v370_v43 = vld [vmem:[%s1294_s5 + $0x110] sm:$0xff] }
  0x84   : > { %v431_v25 = vmul.f32 %v367_v20, %v303_v19  ;;  %v499_v47 = vld [vmem:[%s1302_s28 + $0x118] sm:$0xff]  ;;  %v309_v49 = vld [vmem:[%s1287_s19 + $0x128] sm:$0xff]  ;;  %v498_v51 = vld [vmem:[%s1302_s28 + $0x110] sm:$0xff] }
  0x85   : > { %v556_v26 = vmul.f32 %v492_v21, %v428_v18  ;;  %v308_v52 = vld [vmem:[%s1287_s19 + $0x120] sm:$0xff]  ;;  %v501_v57 = vld [vmem:[%s1302_s28 + $0x128] sm:$0xff]  ;;  %v311_v59 = vld [vmem:[%s1287_s19 + $0x138] sm:$0xff] }
  0x86   : > { %v559_v34 = vmul.f32 %v495_v27, %v431_v25  ;;  %v372_v53 = vld [vmem:[%s1294_s5 + $0x120] sm:$0xff]  ;;  %v310_v62 = vld [vmem:[%s1287_s19 + $0x130] sm:$0xff]  ;;  %v503_v3 = vld [vmem:[%s1302_s28 + $0x138] sm:$0xff] }
  0x87   : > { %626 = vadd.xlane.f32.xlu1 %v545_v28  ;;  %624 = vadd.xlane.f32.xlu0 %v544_v30  ;;  %v430_v28 = vmul.f32 %v366_v23, %v302_v22  ;;  %v369_v30 = vld [vmem:[%s1294_s5 + $0x108] sm:$0xff]  ;;  %v500_v61 = vld [vmem:[%s1302_s28 + $0x120] sm:$0xff]  ;;  %v374_v63 = vld [vmem:[%s1294_s5 + $0x130] sm:$0xff] }
  0x88   : > { %v433_v35 = vmul.f32 %v369_v30, %v305_v29  ;;  %v313_v5 = vld [vmem:[%s1287_s19 + $0x148] sm:$0xff]  ;;  %v502_v7 = vld [vmem:[%s1302_s28 + $0x130] sm:$0xff]  ;;  %v312_v8 = vld [vmem:[%s1287_s19 + $0x140] sm:$0xff] }
  0x89   : > { %v558_v36 = vmul.f32 %v494_v31, %v430_v28  ;;  %v376_v9 = vld [vmem:[%s1294_s5 + $0x140] sm:$0xff]  ;;  %v505_v13 = vld [vmem:[%s1302_s28 + $0x148] sm:$0xff]  ;;  %v315_v15 = vld [vmem:[%s1287_s19 + $0x158] sm:$0xff] }
  0x8a   : > { %v561_v44 = vmul.f32 %v497_v37, %v433_v35  ;;  %v504_v17 = vld [vmem:[%s1302_s28 + $0x140] sm:$0xff]  ;;  %v314_v18 = vld [vmem:[%s1287_s19 + $0x150] sm:$0xff]  ;;  %v507_v23 = vld [vmem:[%s1302_s28 + $0x158] sm:$0xff] }
  0x8b   : > { %630 = vadd.xlane.f32.xlu1 %v547_v38  ;;  %628 = vadd.xlane.f32.xlu0 %v546_v40  ;;  %v432_v38 = vmul.f32 %v368_v33, %v304_v32  ;;  %v371_v40 = vld [vmem:[%s1294_s5 + $0x118] sm:$0xff]  ;;  %v378_v19 = vld [vmem:[%s1294_s5 + $0x150] sm:$0xff]  ;;  %v317_v25 = vld [vmem:[%s1287_s19 + $0x168] sm:$0xff] }
  0x8c   : > { %v435_v45 = vmul.f32 %v371_v40, %v307_v39  ;;  %v506_v27 = vld [vmem:[%s1302_s28 + $0x150] sm:$0xff]  ;;  %v316_v28 = vld [vmem:[%s1287_s19 + $0x160] sm:$0xff]  ;;  %v509_v33 = vld [vmem:[%s1302_s28 + $0x168] sm:$0xff] }
  0x8d   : > { %v560_v46 = vmul.f32 %v496_v41, %v432_v38  ;;  %v380_v29 = vld [vmem:[%s1294_s5 + $0x160] sm:$0xff]  ;;  %v319_v35 = vld [vmem:[%s1287_s19 + $0x178] sm:$0xff]  ;;  %v318_v38 = vld [vmem:[%s1287_s19 + $0x170] sm:$0xff] }
  0x8e   : > { %v563_v54 = vmul.f32 %v499_v47, %v435_v45  ;;  %v508_v37 = vld [vmem:[%s1302_s28 + $0x160] sm:$0xff]  ;;  %v382_v39 = vld [vmem:[%s1294_s5 + $0x170] sm:$0xff]  ;;  %v321_v45 = vld [vmem:[%s1287_s19 + $0x188] sm:$0xff] }
  0x8f   : > { %634 = vadd.xlane.f32.xlu1 %v549_v48  ;;  %632 = vadd.xlane.f32.xlu0 %v548_v50  ;;  %v434_v48 = vmul.f32 %v370_v43, %v306_v42  ;;  %v373_v50 = vld [vmem:[%s1294_s5 + $0x128] sm:$0xff]  ;;  %v511_v43 = vld [vmem:[%s1302_s28 + $0x178] sm:$0xff]  ;;  %v510_v47 = vld [vmem:[%s1302_s28 + $0x170] sm:$0xff] }
  0x90   : > { %v437_v55 = vmul.f32 %v373_v50, %v309_v49  ;;  %v384_v49 = vld [vmem:[%s1294_s5 + $0x180] sm:$0xff] }
  0x91   : > { %v562_v56 = vmul.f32 %v498_v51, %v434_v48  ;;  %v320_v48 = vld [vmem:[%s1287_s19 + $0x180] sm:$0xff] }
  0x92   : > { %v565_v0 = vmul.f32 %v501_v57, %v437_v55  ;;  %v323_v55 = vld [vmem:[%s1287_s19 + $0x198] sm:$0xff]  ;;  %v512_v57 = vld [vmem:[%s1302_s28 + $0x180] sm:$0xff] }
  0x93   : > { %638 = vadd.xlane.f32.xlu1 %v551_v58  ;;  %636 = vadd.xlane.f32.xlu0 %v550_v60  ;;  %v436_v58 = vmul.f32 %v372_v53, %v308_v52  ;;  %v375_v60 = vld [vmem:[%s1294_s5 + $0x138] sm:$0xff]  ;;  %v513_v53 = vld [vmem:[%s1302_s28 + $0x188] sm:$0xff] }
  0x94   : > { %v439_v1 = vmul.f32 %v375_v60, %v311_v59  ;;  %v386_v59 = vld [vmem:[%s1294_s5 + $0x190] sm:$0xff] }
  0x95   : > { %v564_v2 = vmul.f32 %v500_v61, %v436_v58  ;;  %v322_v58 = vld [vmem:[%s1287_s19 + $0x190] sm:$0xff] }
  0x96   : > { %v567_v10 = vmul.f32 %v503_v3, %v439_v1  ;;  %v325_v1 = vld [vmem:[%s1287_s19 + $0x1a8] sm:$0xff]  ;;  %v514_v3 = vld [vmem:[%s1302_s28 + $0x190] sm:$0xff] }
  0x97   : > { %642 = vadd.xlane.f32.xlu1 %v553_v4  ;;  %640 = vadd.xlane.f32.xlu0 %v552_v6  ;;  %v438_v4 = vmul.f32 %v374_v63, %v310_v62  ;;  %v377_v6 = vld [vmem:[%s1294_s5 + $0x148] sm:$0xff]  ;;  %v515_v63 = vld [vmem:[%s1302_s28 + $0x198] sm:$0xff] }
  0x98   : > { %v441_v11 = vmul.f32 %v377_v6, %v313_v5  ;;  %v388_v5 = vld [vmem:[%s1294_s5 + $0x1a0] sm:$0xff] }
  0x99   : > { %v566_v12 = vmul.f32 %v502_v7, %v438_v4  ;;  %v324_v4 = vld [vmem:[%s1287_s19 + $0x1a0] sm:$0xff] }
  0x9a   : > { %v569_v20 = vmul.f32 %v505_v13, %v441_v11  ;;  %v327_v11 = vld [vmem:[%s1287_s19 + $0x1b8] sm:$0xff]  ;;  %v516_v13 = vld [vmem:[%s1302_s28 + $0x1a0] sm:$0xff] }
  0x9b   : > { %646 = vadd.xlane.f32.xlu1 %v555_v14  ;;  %644 = vadd.xlane.f32.xlu0 %v554_v16  ;;  %v440_v14 = vmul.f32 %v376_v9, %v312_v8  ;;  %v379_v16 = vld [vmem:[%s1294_s5 + $0x158] sm:$0xff]  ;;  %v517_v9 = vld [vmem:[%s1302_s28 + $0x1a8] sm:$0xff] }
  0x9c   : > { %v443_v21 = vmul.f32 %v379_v16, %v315_v15  ;;  %v390_v15 = vld [vmem:[%s1294_s5 + $0x1b0] sm:$0xff] }
  0x9d   : > { %v568_v22 = vmul.f32 %v504_v17, %v440_v14  ;;  %v326_v14 = vld [vmem:[%s1287_s19 + $0x1b0] sm:$0xff] }
  0x9e   : > { %v571_v30 = vmul.f32 %v507_v23, %v443_v21  ;;  %v329_v21 = vld [vmem:[%s1287_s19 + $0x1c8] sm:$0xff]  ;;  %v518_v23 = vld [vmem:[%s1302_s28 + $0x1b0] sm:$0xff] }
  0x9f   : > { %650 = vadd.xlane.f32.xlu1 %v557_v24  ;;  %648 = vadd.xlane.f32.xlu0 %v556_v26  ;;  %v442_v24 = vmul.f32 %v378_v19, %v314_v18  ;;  %v381_v26 = vld [vmem:[%s1294_s5 + $0x168] sm:$0xff]  ;;  %v519_v19 = vld [vmem:[%s1302_s28 + $0x1b8] sm:$0xff] }
  0xa0   : > { %v445_v31 = vmul.f32 %v381_v26, %v317_v25  ;;  %v392_v25 = vld [vmem:[%s1294_s5 + $0x1c0] sm:$0xff] }
  0xa1   : > { %v570_v32 = vmul.f32 %v506_v27, %v442_v24  ;;  %v328_v24 = vld [vmem:[%s1287_s19 + $0x1c0] sm:$0xff] }
  0xa2   : > { %v573_v40 = vmul.f32 %v509_v33, %v445_v31  ;;  %v331_v31 = vld [vmem:[%s1287_s19 + $0x1d8] sm:$0xff]  ;;  %v520_v33 = vld [vmem:[%s1302_s28 + $0x1c0] sm:$0xff] }
  0xa3   : > { %654 = vadd.xlane.f32.xlu1 %v559_v34  ;;  %652 = vadd.xlane.f32.xlu0 %v558_v36  ;;  %v444_v34 = vmul.f32 %v380_v29, %v316_v28  ;;  %v383_v36 = vld [vmem:[%s1294_s5 + $0x178] sm:$0xff]  ;;  %v521_v29 = vld [vmem:[%s1302_s28 + $0x1c8] sm:$0xff] }
  0xa4   : > { %v447_v41 = vmul.f32 %v383_v36, %v319_v35  ;;  %v394_v35 = vld [vmem:[%s1294_s5 + $0x1d0] sm:$0xff] }
  0xa5   : > { %v572_v42 = vmul.f32 %v508_v37, %v444_v34  ;;  %v330_v34 = vld [vmem:[%s1287_s19 + $0x1d0] sm:$0xff] }
  0xa6   : > { %v575_v50 = vmul.f32 %v511_v43, %v447_v41  ;;  %v333_v41 = vld [vmem:[%s1287_s19 + $0x1e8] sm:$0xff]  ;;  %v522_v43 = vld [vmem:[%s1302_s28 + $0x1d0] sm:$0xff] }
  0xa7   : > { %658 = vadd.xlane.f32.xlu1 %v561_v44  ;;  %656 = vadd.xlane.f32.xlu0 %v560_v46  ;;  %v446_v44 = vmul.f32 %v382_v39, %v318_v38  ;;  %v385_v46 = vld [vmem:[%s1294_s5 + $0x188] sm:$0xff]  ;;  %v523_v39 = vld [vmem:[%s1302_s28 + $0x1d8] sm:$0xff] }
  0xa8   : > { %v449_v51 = vmul.f32 %v385_v46, %v321_v45  ;;  %v396_v45 = vld [vmem:[%s1294_s5 + $0x1e0] sm:$0xff] }
  0xa9   : > { %v574_v52 = vmul.f32 %v510_v47, %v446_v44  ;;  %v332_v44 = vld [vmem:[%s1287_s19 + $0x1e0] sm:$0xff] }
  0xaa   : > { %v577_v60 = vmul.f32 %v513_v53, %v449_v51  ;;  %v335_v51 = vld [vmem:[%s1287_s19 + $0x1f8] sm:$0xff]  ;;  %v524_v53 = vld [vmem:[%s1302_s28 + $0x1e0] sm:$0xff] }
  0xab   : > { %662 = vadd.xlane.f32.xlu1 %v563_v54  ;;  %660 = vadd.xlane.f32.xlu0 %v562_v56  ;;  %v448_v54 = vmul.f32 %v384_v49, %v320_v48  ;;  %v387_v56 = vld [vmem:[%s1294_s5 + $0x198] sm:$0xff]  ;;  %v525_v49 = vld [vmem:[%s1302_s28 + $0x1e8] sm:$0xff] }
  0xac   : > { %v451_v61 = vmul.f32 %v387_v56, %v323_v55  ;;  %v398_v55 = vld [vmem:[%s1294_s5 + $0x1f0] sm:$0xff] }
  0xad   : > { %v576_v62 = vmul.f32 %v512_v57, %v448_v54  ;;  %v334_v54 = vld [vmem:[%s1287_s19 + $0x1f0] sm:$0xff] }
  0xae   : > { %v579_v6 = vmul.f32 %v515_v63, %v451_v61  ;;  %v526_v61 = vld [vmem:[%s1302_s28 + $0x1f0] sm:$0xff] }
  0xaf   : > { %666 = vadd.xlane.f32.xlu1 %v565_v0  ;;  %664 = vadd.xlane.f32.xlu0 %v564_v2  ;;  %v450_v0 = vmul.f32 %v386_v59, %v322_v58  ;;  %v389_v2 = vld [vmem:[%s1294_s5 + $0x1a8] sm:$0xff]  ;;  %v527_v59 = vld [vmem:[%s1302_s28 + $0x1f8] sm:$0xff] }
  0xb0   : > { %v453_v7 = vmul.f32 %v389_v2, %v325_v1 }
  0xb1   : > { %v578_v8 = vmul.f32 %v514_v3, %v450_v0 }
  0xb2   : > { %v581_v16 = vmul.f32 %v517_v9, %v453_v7 }
  0xb3   : > { %670 = vadd.xlane.f32.xlu1 %v567_v10  ;;  %668 = vadd.xlane.f32.xlu0 %v566_v12  ;;  %v452_v10 = vmul.f32 %v388_v5, %v324_v4  ;;  %v391_v12 = vld [vmem:[%s1294_s5 + $0x1b8] sm:$0xff] }
  0xb4   : > { %v455_v17 = vmul.f32 %v391_v12, %v327_v11 }
  0xb5   : > { %v580_v18 = vmul.f32 %v516_v13, %v452_v10 }
  0xb6   : > { %v583_v26 = vmul.f32 %v519_v19, %v455_v17 }
  0xb7   : > { %674 = vadd.xlane.f32.xlu1 %v569_v20  ;;  %672 = vadd.xlane.f32.xlu0 %v568_v22  ;;  %v454_v20 = vmul.f32 %v390_v15, %v326_v14  ;;  %v393_v22 = vld [vmem:[%s1294_s5 + $0x1c8] sm:$0xff] }
  0xb8   : > { %v457_v27 = vmul.f32 %v393_v22, %v329_v21 }
  0xb9   : > { %v582_v28 = vmul.f32 %v518_v23, %v454_v20 }
  0xba   : > { %v585_v36 = vmul.f32 %v521_v29, %v457_v27 }
  0xbb   : > { %678 = vadd.xlane.f32.xlu1 %v571_v30  ;;  %676 = vadd.xlane.f32.xlu0 %v570_v32  ;;  %v456_v30 = vmul.f32 %v392_v25, %v328_v24  ;;  %v395_v32 = vld [vmem:[%s1294_s5 + $0x1d8] sm:$0xff] }
  0xbc   : > { %v459_v37 = vmul.f32 %v395_v32, %v331_v31 }
  0xbd   : > { %v584_v38 = vmul.f32 %v520_v33, %v456_v30 }
  0xbe   : > { %v587_v46 = vmul.f32 %v523_v39, %v459_v37 }
  0xbf   : > { %682 = vadd.xlane.f32.xlu1 %v573_v40  ;;  %680 = vadd.xlane.f32.xlu0 %v572_v42  ;;  %v458_v40 = vmul.f32 %v394_v35, %v330_v34  ;;  %v397_v42 = vld [vmem:[%s1294_s5 + $0x1e8] sm:$0xff] }
  0xc0   : > { %v461_v47 = vmul.f32 %v397_v42, %v333_v41 }
  0xc1   : > { %v586_v48 = vmul.f32 %v522_v43, %v458_v40 }
  0xc2   : > { %v589_v56 = vmul.f32 %v525_v49, %v461_v47 }
  0xc3   : > { %686 = vadd.xlane.f32.xlu1 %v575_v50  ;;  %684 = vadd.xlane.f32.xlu0 %v574_v52  ;;  %v460_v50 = vmul.f32 %v396_v45, %v332_v44  ;;  %v399_v52 = vld [vmem:[%s1294_s5 + $0x1f8] sm:$0xff] }
  0xc4   : > { %v463_v57 = vmul.f32 %v399_v52, %v335_v51 }
  0xc5   : > { %v588_v58 = vmul.f32 %v524_v53, %v460_v50 }
  0xc7   : > { %690 = vadd.xlane.f32.xlu1 %v577_v60  ;;  %688 = vadd.xlane.f32.xlu0 %v576_v62  ;;  %v462_v60 = vmul.f32 %v398_v55, %v334_v54  ;;  %v591_v62 = vmul.f32 %v527_v59, %v463_v57 }
  0xc9   : > { %v590_v63 = vmul.f32 %v526_v61, %v462_v60 }
  0xcb   : > { %694 = vadd.xlane.f32.xlu1 %v579_v6  ;;  %692 = vadd.xlane.f32.xlu0 %v578_v8 }
  0xcf   : > { %698 = vadd.xlane.f32.xlu1 %v581_v16  ;;  %696 = vadd.xlane.f32.xlu0 %v580_v18 }
  0xd3   : > { %702 = vadd.xlane.f32.xlu1 %v583_v26  ;;  %700 = vadd.xlane.f32.xlu0 %v582_v28 }
  0xd7   : > { %706 = vadd.xlane.f32.xlu1 %v585_v36  ;;  %704 = vadd.xlane.f32.xlu0 %v584_v38 }
  0xdb   : > { %710 = vadd.xlane.f32.xlu1 %v587_v46  ;;  %708 = vadd.xlane.f32.xlu0 %v586_v48 }
  0xdf   : > { %714 = vadd.xlane.f32.xlu1 %v589_v56  ;;  %712 = vadd.xlane.f32.xlu0 %v588_v58 }
  0xe3   : > { %718 = vadd.xlane.f32.xlu1 %v591_v62  ;;  %716 = vadd.xlane.f32.xlu0 %v590_v63 }
  0xf0   : > { %v597_v0 = vpop.xlane.xlu1 %596  ;;  %v593_v1 = vpop.xlane.xlu0 %592 }
  0xf1   : > { %723 = vst.msk [vmem:[%s1498_s26 + $0x10] sm:$0xff] %vm720_vm0, %v597_v0  ;;  %721 = vst.msk [vmem:[%s1498_s26] sm:$0xff] %vm720_vm0, %v593_v1 }
  0xf4   : > { %v599_v2 = vpop.xlane.xlu1 %598  ;;  %v595_v3 = vpop.xlane.xlu0 %594 }
  0xf5   : > { %724 = vst.msk [vmem:[%s1498_s26 + $0x18] sm:$0xff] %vm720_vm0, %v599_v2  ;;  %722 = vst.msk [vmem:[%s1498_s26 + $0x8] sm:$0xff] %vm720_vm0, %v595_v3 }
  0xf8   : > { %v603_v4 = vpop.xlane.xlu1 %602  ;;  %v601_v5 = vpop.xlane.xlu0 %600 }
  0xf9   : > { %726 = vst.msk [vmem:[%s1498_s26 + $0x28] sm:$0xff] %vm720_vm0, %v603_v4  ;;  %725 = vst.msk [vmem:[%s1498_s26 + $0x20] sm:$0xff] %vm720_vm0, %v601_v5 }
  0xfc   : > { %v607_v6 = vpop.xlane.xlu1 %606  ;;  %v605_v7 = vpop.xlane.xlu0 %604 }
  0xfd   : > { %728 = vst.msk [vmem:[%s1498_s26 + $0x38] sm:$0xff] %vm720_vm0, %v607_v6  ;;  %727 = vst.msk [vmem:[%s1498_s26 + $0x30] sm:$0xff] %vm720_vm0, %v605_v7 }
 0x100   : > { %v611_v8 = vpop.xlane.xlu1 %610  ;;  %v609_v9 = vpop.xlane.xlu0 %608 }
 0x101   : > { %730 = vst.msk [vmem:[%s1498_s26 + $0x48] sm:$0xff] %vm720_vm0, %v611_v8  ;;  %729 = vst.msk [vmem:[%s1498_s26 + $0x40] sm:$0xff] %vm720_vm0, %v609_v9 }
 0x104   : > { %v615_v10 = vpop.xlane.xlu1 %614  ;;  %v613_v11 = vpop.xlane.xlu0 %612 }
 0x105   : > { %732 = vst.msk [vmem:[%s1498_s26 + $0x58] sm:$0xff] %vm720_vm0, %v615_v10  ;;  %731 = vst.msk [vmem:[%s1498_s26 + $0x50] sm:$0xff] %vm720_vm0, %v613_v11 }
 0x108   : > { %v619_v12 = vpop.xlane.xlu1 %618  ;;  %v617_v13 = vpop.xlane.xlu0 %616 }
 0x109   : > { %734 = vst.msk [vmem:[%s1498_s26 + $0x68] sm:$0xff] %vm720_vm0, %v619_v12  ;;  %733 = vst.msk [vmem:[%s1498_s26 + $0x60] sm:$0xff] %vm720_vm0, %v617_v13 }
 0x10c   : > { %v623_v14 = vpop.xlane.xlu1 %622  ;;  %v621_v15 = vpop.xlane.xlu0 %620 }
 0x10d   : > { %736 = vst.msk [vmem:[%s1498_s26 + $0x78] sm:$0xff] %vm720_vm0, %v623_v14  ;;  %735 = vst.msk [vmem:[%s1498_s26 + $0x70] sm:$0xff] %vm720_vm0, %v621_v15 }
 0x110   : > { %v627_v16 = vpop.xlane.xlu1 %626  ;;  %v625_v17 = vpop.xlane.xlu0 %624 }
 0x111   : > { %738 = vst.msk [vmem:[%s1498_s26 + $0x88] sm:$0xff] %vm720_vm0, %v627_v16  ;;  %737 = vst.msk [vmem:[%s1498_s26 + $0x80] sm:$0xff] %vm720_vm0, %v625_v17 }
 0x114   : > { %v631_v18 = vpop.xlane.xlu1 %630  ;;  %v629_v19 = vpop.xlane.xlu0 %628 }
 0x115   : > { %740 = vst.msk [vmem:[%s1498_s26 + $0x98] sm:$0xff] %vm720_vm0, %v631_v18  ;;  %739 = vst.msk [vmem:[%s1498_s26 + $0x90] sm:$0xff] %vm720_vm0, %v629_v19 }
 0x118   : > { %v635_v20 = vpop.xlane.xlu1 %634  ;;  %v633_v21 = vpop.xlane.xlu0 %632 }
 0x119   : > { %742 = vst.msk [vmem:[%s1498_s26 + $0xa8] sm:$0xff] %vm720_vm0, %v635_v20  ;;  %741 = vst.msk [vmem:[%s1498_s26 + $0xa0] sm:$0xff] %vm720_vm0, %v633_v21 }
 0x11c   : > { %v639_v22 = vpop.xlane.xlu1 %638  ;;  %v637_v23 = vpop.xlane.xlu0 %636 }
 0x11d   : > { %744 = vst.msk [vmem:[%s1498_s26 + $0xb8] sm:$0xff] %vm720_vm0, %v639_v22  ;;  %743 = vst.msk [vmem:[%s1498_s26 + $0xb0] sm:$0xff] %vm720_vm0, %v637_v23 }
 0x120   : > { %v643_v24 = vpop.xlane.xlu1 %642  ;;  %v641_v25 = vpop.xlane.xlu0 %640 }
 0x121   : > { %746 = vst.msk [vmem:[%s1498_s26 + $0xc8] sm:$0xff] %vm720_vm0, %v643_v24  ;;  %745 = vst.msk [vmem:[%s1498_s26 + $0xc0] sm:$0xff] %vm720_vm0, %v641_v25 }
 0x124   : > { %v647_v26 = vpop.xlane.xlu1 %646  ;;  %v645_v27 = vpop.xlane.xlu0 %644 }
 0x125   : > { %748 = vst.msk [vmem:[%s1498_s26 + $0xd8] sm:$0xff] %vm720_vm0, %v647_v26  ;;  %747 = vst.msk [vmem:[%s1498_s26 + $0xd0] sm:$0xff] %vm720_vm0, %v645_v27 }
 0x128   : > { %v651_v28 = vpop.xlane.xlu1 %650  ;;  %v649_v29 = vpop.xlane.xlu0 %648 }
 0x129   : > { %750 = vst.msk [vmem:[%s1498_s26 + $0xe8] sm:$0xff] %vm720_vm0, %v651_v28  ;;  %749 = vst.msk [vmem:[%s1498_s26 + $0xe0] sm:$0xff] %vm720_vm0, %v649_v29 }
 0x12c   : > { %v655_v30 = vpop.xlane.xlu1 %654  ;;  %v653_v31 = vpop.xlane.xlu0 %652 }
 0x12d   : > { %752 = vst.msk [vmem:[%s1498_s26 + $0xf8] sm:$0xff] %vm720_vm0, %v655_v30  ;;  %751 = vst.msk [vmem:[%s1498_s26 + $0xf0] sm:$0xff] %vm720_vm0, %v653_v31 }
 0x130   : > { %v659_v32 = vpop.xlane.xlu1 %658  ;;  %v657_v33 = vpop.xlane.xlu0 %656 }
 0x131   : > { %754 = vst.msk [vmem:[%s1498_s26 + $0x108] sm:$0xff] %vm720_vm0, %v659_v32  ;;  %753 = vst.msk [vmem:[%s1498_s26 + $0x100] sm:$0xff] %vm720_vm0, %v657_v33 }
 0x134   : > { %v663_v34 = vpop.xlane.xlu1 %662  ;;  %v661_v35 = vpop.xlane.xlu0 %660 }
 0x135   : > { %756 = vst.msk [vmem:[%s1498_s26 + $0x118] sm:$0xff] %vm720_vm0, %v663_v34  ;;  %755 = vst.msk [vmem:[%s1498_s26 + $0x110] sm:$0xff] %vm720_vm0, %v661_v35 }
 0x138   : > { %v667_v36 = vpop.xlane.xlu1 %666  ;;  %v665_v37 = vpop.xlane.xlu0 %664 }
 0x139   : > { %758 = vst.msk [vmem:[%s1498_s26 + $0x128] sm:$0xff] %vm720_vm0, %v667_v36  ;;  %757 = vst.msk [vmem:[%s1498_s26 + $0x120] sm:$0xff] %vm720_vm0, %v665_v37 }
 0x13c   : > { %v671_v38 = vpop.xlane.xlu1 %670  ;;  %v669_v39 = vpop.xlane.xlu0 %668 }
 0x13d   : > { %760 = vst.msk [vmem:[%s1498_s26 + $0x138] sm:$0xff] %vm720_vm0, %v671_v38  ;;  %759 = vst.msk [vmem:[%s1498_s26 + $0x130] sm:$0xff] %vm720_vm0, %v669_v39 }
 0x140   : > { %v675_v40 = vpop.xlane.xlu1 %674  ;;  %v673_v41 = vpop.xlane.xlu0 %672 }
 0x141   : > { %762 = vst.msk [vmem:[%s1498_s26 + $0x148] sm:$0xff] %vm720_vm0, %v675_v40  ;;  %761 = vst.msk [vmem:[%s1498_s26 + $0x140] sm:$0xff] %vm720_vm0, %v673_v41 }
 0x144   : > { %v679_v42 = vpop.xlane.xlu1 %678  ;;  %v677_v43 = vpop.xlane.xlu0 %676 }
 0x145   : > { %764 = vst.msk [vmem:[%s1498_s26 + $0x158] sm:$0xff] %vm720_vm0, %v679_v42  ;;  %763 = vst.msk [vmem:[%s1498_s26 + $0x150] sm:$0xff] %vm720_vm0, %v677_v43 }
 0x148   : > { %v683_v44 = vpop.xlane.xlu1 %682  ;;  %v681_v45 = vpop.xlane.xlu0 %680 }
 0x149   : > { %766 = vst.msk [vmem:[%s1498_s26 + $0x168] sm:$0xff] %vm720_vm0, %v683_v44  ;;  %765 = vst.msk [vmem:[%s1498_s26 + $0x160] sm:$0xff] %vm720_vm0, %v681_v45 }
 0x14c   : > { %v687_v46 = vpop.xlane.xlu1 %686  ;;  %v685_v47 = vpop.xlane.xlu0 %684 }
 0x14d   : > { %768 = vst.msk [vmem:[%s1498_s26 + $0x178] sm:$0xff] %vm720_vm0, %v687_v46  ;;  %767 = vst.msk [vmem:[%s1498_s26 + $0x170] sm:$0xff] %vm720_vm0, %v685_v47 }
 0x150   : > { %v691_v48 = vpop.xlane.xlu1 %690  ;;  %v689_v49 = vpop.xlane.xlu0 %688 }
 0x151   : > { %770 = vst.msk [vmem:[%s1498_s26 + $0x188] sm:$0xff] %vm720_vm0, %v691_v48  ;;  %769 = vst.msk [vmem:[%s1498_s26 + $0x180] sm:$0xff] %vm720_vm0, %v689_v49 }
 0x154   : > { %v695_v50 = vpop.xlane.xlu1 %694  ;;  %v693_v51 = vpop.xlane.xlu0 %692 }
 0x155   : > { %772 = vst.msk [vmem:[%s1498_s26 + $0x198] sm:$0xff] %vm720_vm0, %v695_v50  ;;  %771 = vst.msk [vmem:[%s1498_s26 + $0x190] sm:$0xff] %vm720_vm0, %v693_v51 }
 0x158   : > { %v699_v52 = vpop.xlane.xlu1 %698  ;;  %v697_v53 = vpop.xlane.xlu0 %696 }
 0x159   : > { %774 = vst.msk [vmem:[%s1498_s26 + $0x1a8] sm:$0xff] %vm720_vm0, %v699_v52  ;;  %773 = vst.msk [vmem:[%s1498_s26 + $0x1a0] sm:$0xff] %vm720_vm0, %v697_v53 }
 0x15c   : > { %v703_v54 = vpop.xlane.xlu1 %702  ;;  %v701_v55 = vpop.xlane.xlu0 %700 }
 0x15d   : > { %776 = vst.msk [vmem:[%s1498_s26 + $0x1b8] sm:$0xff] %vm720_vm0, %v703_v54  ;;  %775 = vst.msk [vmem:[%s1498_s26 + $0x1b0] sm:$0xff] %vm720_vm0, %v701_v55 }
 0x160   : > { %v707_v56 = vpop.xlane.xlu1 %706  ;;  %v705_v57 = vpop.xlane.xlu0 %704 }
 0x161   : > { %778 = vst.msk [vmem:[%s1498_s26 + $0x1c8] sm:$0xff] %vm720_vm0, %v707_v56  ;;  %777 = vst.msk [vmem:[%s1498_s26 + $0x1c0] sm:$0xff] %vm720_vm0, %v705_v57 }
 0x164   : > { %v711_v58 = vpop.xlane.xlu1 %710  ;;  %v709_v59 = vpop.xlane.xlu0 %708 }
 0x165   : > { %780 = vst.msk [vmem:[%s1498_s26 + $0x1d8] sm:$0xff] %vm720_vm0, %v711_v58  ;;  %779 = vst.msk [vmem:[%s1498_s26 + $0x1d0] sm:$0xff] %vm720_vm0, %v709_v59 }
 0x168   : > { %v715_v60 = vpop.xlane.xlu1 %714  ;;  %v713_v61 = vpop.xlane.xlu0 %712 }
 0x169   : > { %782 = vst.msk [vmem:[%s1498_s26 + $0x1e8] sm:$0xff] %vm720_vm0, %v715_v60  ;;  %781 = vst.msk [vmem:[%s1498_s26 + $0x1e0] sm:$0xff] %vm720_vm0, %v713_v61 }
 0x16c   : > { %v719_v62 = vpop.xlane.xlu1 %718  ;;  %v717_v63 = vpop.xlane.xlu0 %716 }
 0x16d   : > { %784 = vst.msk [vmem:[%s1498_s26 + $0x1f8] sm:$0xff] %vm720_vm0, %v719_v62  ;;  %783 = vst.msk [vmem:[%s1498_s26 + $0x1f0] sm:$0xff] %vm720_vm0, %v717_v63 }
 0x16e PF: > { %p16_p4 = scmp.ge.s32.totalorder %s1141_s17, 4   ;;  %s1654_s12 = smov %s1084_s13 }
 0x16f   : > { %s1655_s13 = smov %s1088_s14  ;;  %s1656_s14 = smov %s1151_s20 }
 0x170   : > { %s1657_s15 = smov %s1141_s17  ;;  %18 = sbr.rel (!%p16_p4) target bundleno = 5 (0x5), region = 96 }
 0x175   :  { %807 = vsyncpa [#allocation3], 1 }
 0x176   :  { %809 = vsyncpa [#allocation3 + $0x1], 1 }
 0x177   :  { %810 = vsyncpa [#allocation5], 1 }
 0x178   :  { %812 = vsyncpa [#allocation5 + $0x1], 1 }

</bundles_post_ra>
